<compile_context>
chip_gen: v6e
topology: v6e:2x2x1
jax: 0.10.0
libtpu: 0.0.40
codegen_flags: <defaults>
</compile_context>

<pallas_src>
import functools

import jax
import jax.numpy as jnp
import numpy as np
from jax.experimental import pallas as pl
from jax.experimental.pallas import tpu as pltpu

LN_EPS = 1e-5
NEG_BIG = -1e30   # large-but-finite mask value; exp() underflows to exactly 0


def _layer_norm(v, gamma):
    # F.layer_norm over the last dim, biased variance, beta == 0 buffer; stats in f32.
    mu = jnp.mean(v, axis=-1, keepdims=True)
    var = jnp.mean(jnp.square(v - mu), axis=-1, keepdims=True)
    return (v - mu) * jax.lax.rsqrt(var + LN_EPS) * gamma


# ---------------------------------------------------------------------------
# Pass 1: LayerNorm1 + Q/K/V projection (grid: batch x seq-tile)
# ---------------------------------------------------------------------------
def qkv_proj_kernel(x_ref, g1_ref, wq_ref, wk_ref, wv_ref,
                    q_ref, k_ref, v_ref, *, scale):
    xn_bf = _layer_norm(x_ref[0], g1_ref[...]).astype(jnp.bfloat16)
    q = jnp.dot(xn_bf, wq_ref[...], preferred_element_type=jnp.float32)
    q_ref[0] = (q * scale).astype(jnp.bfloat16)          # fold dh^-0.5 into Q
    k_ref[0] = jnp.dot(xn_bf, wk_ref[...],
                       preferred_element_type=jnp.float32).astype(jnp.bfloat16)
    v_ref[0] = jnp.dot(xn_bf, wv_ref[...],
                       preferred_element_type=jnp.float32).astype(jnp.bfloat16)


# ---------------------------------------------------------------------------
# Pass 2: flash-style causal attention + Wo + LayerNorm2 + FF
# grid: (batch, query-tile, key-tile); key-tile is the innermost (arbitrary) axis.
# ---------------------------------------------------------------------------
def attn_ff_kernel(q_ref, k_ref, v_ref, g2_ref, wo_ref, w1_ref, b1_ref,
                   w2_ref, b2_ref, y_ref, m_scr, l_scr, acc_scr,
                   *, heads, tq, tk):
    dim = q_ref.shape[2]
    dh = dim // heads
    qi = pl.program_id(1)
    ki = pl.program_id(2)
    n_k = pl.num_programs(2)

    @pl.when(ki == 0)
    def _():
        m_scr[...] = jnp.full_like(m_scr, NEG_BIG)
        l_scr[...] = jnp.zeros_like(l_scr)
        acc_scr[...] = jnp.zeros_like(acc_scr)

    # Causally-dead key tiles (ki > qi): skip compute; the K/V index_map clamps the
    # block index to qi so no new DMA is issued for these iterations either.
    @pl.when(ki <= qi)
    def _():
        q_bf = q_ref[0]                                   # (tq, dim) bf16, pre-scaled
        k_bf = k_ref[0]                                   # (tk, dim) bf16
        v_bf = v_ref[0]                                   # (tk, dim) bf16

        # Additive causal bias, computed once per (qi, ki) tile, shared by all heads.
        # (For a single-token sequence it is identically zero, matching the module.)
        row = qi * tq + jax.lax.broadcasted_iota(jnp.int32, (tq, tk), 0)
        col = ki * tk + jax.lax.broadcasted_iota(jnp.int32, (tq, tk), 1)
        bias = jnp.where(col > row, NEG_BIG, 0.0).astype(jnp.float32)

        for hh in range(heads):                           # static unroll over heads
            lo = hh * dh
            s = jax.lax.dot_general(q_bf[:, lo:lo + dh], k_bf[:, lo:lo + dh],
                                    (((1,), (1,)), ((), ())),
                                    preferred_element_type=jnp.float32) + bias
            m_prev = m_scr[hh]                            # (tq, 1)
            m_new = jnp.maximum(m_prev, jnp.max(s, axis=-1, keepdims=True))
            alpha = jnp.exp(m_prev - m_new)
            p = jnp.exp(s - m_new)                        # (tq, tk)
            l_scr[hh] = alpha * l_scr[hh] + jnp.sum(p, axis=-1, keepdims=True)
            pv = jax.lax.dot_general(p.astype(jnp.bfloat16), v_bf[:, lo:lo + dh],
                                     (((1,), (0,)), ((), ())),
                                     preferred_element_type=jnp.float32)
            acc_scr[:, lo:lo + dh] = alpha * acc_scr[:, lo:lo + dh] + pv
            m_scr[hh] = m_new

    @pl.when(ki == n_k - 1)
    def _():
        # Normalize each head's columns, then ONE (tq, dim) @ (dim, dim) Wo matmul.
        for hh in range(heads):
            lo = hh * dh
            inv_l = pl.reciprocal(l_scr[hh], approx=True)           # (tq, 1)
            acc_scr[:, lo:lo + dh] = acc_scr[:, lo:lo + dh] * inv_l
        attn = jnp.dot(acc_scr[...].astype(jnp.bfloat16), wo_ref[...],
                       preferred_element_type=jnp.float32)
        # norm2 + feed-forward (Linear -> exact GELU -> Linear) on the tile.
        xn2_bf = _layer_norm(attn, g2_ref[...]).astype(jnp.bfloat16)
        h1 = jnp.dot(xn2_bf, w1_ref[...],
                     preferred_element_type=jnp.float32) + b1_ref[...]
        h1 = 0.5 * h1 * (1.0 + jax.lax.erf(h1 * (2.0 ** -0.5)))
        y_ref[0] = jnp.dot(h1.astype(jnp.bfloat16), w2_ref[...],
                           preferred_element_type=jnp.float32) + b2_ref[...]


# ---------------------------------------------------------------------------
# Tiling / VMEM heuristics
# ---------------------------------------------------------------------------
def _pick_tq(n):
    """Query/key tile: MXU-shaped (<=256), multiple of 8; n is padded to a multiple."""
    if n <= 256:
        return ((n + 7) // 8) * 8
    return 256


def _vmem_limit(est_bytes):
    """Override the scoped-VMEM limit only when the estimate exceeds the smallest
    per-generation default (16 MiB on v5e); cap at 3/4 of physical VMEM."""
    if est_bytes <= (16 << 20) - (2 << 20):
        return None
    try:
        cap = pltpu.get_tpu_info().vmem_capacity_bytes   # 64 MiB v7x / 128 MiB v5e,v6e
    except Exception:
        cap = 64 << 20
    return int(min(est_bytes + (8 << 20), (cap * 3) // 4))


def _est_qkv_vmem(tq, dim):
    f32, bf16 = 4, 2
    blocks = 2 * (tq * dim * f32 + dim * f32
                  + 3 * dim * dim * bf16 + 3 * tq * dim * bf16)
    return blocks + 6 * tq * dim * f32


def _est_attn_vmem(tq, tk, dim, inner, heads):
    f32, bf16 = 4, 2
    blocks = 2 * (3 * tq * dim * bf16
                  + (dim * dim + 2 * dim * inner) * bf16
                  + (2 * dim + inner) * f32
                  + tq * dim * f32)
    scratch = tq * dim * f32 + 2 * heads * tq * 128 * f32
    working = (4 * tq * tk + 2 * tq * inner + 6 * tq * dim) * f32
    return blocks + scratch + working


def _const_spec(shape, pipeline_mode):
    idx = lambda *_: (0,) * len(shape)
    if pipeline_mode is None:
        return pl.BlockSpec(shape, idx)
    return pl.BlockSpec(shape, idx, pipeline_mode=pipeline_mode)


# ---------------------------------------------------------------------------
# Wrapper
# ---------------------------------------------------------------------------
def _dec_layer_impl(x, params, *, heads, single_buffer_weights):
    B, n, dim = x.shape
    assert dim % heads == 0
    dh = dim // heads
    inner = params["w1"].shape[1]

    tq = _pick_tq(n)
    tk = tq
    n_pad = ((n + tq - 1) // tq) * tq
    if n_pad != n:
        x = jnp.pad(x, ((0, 0), (0, n_pad - n), (0, 0)))
    n_q = n_pad // tq

    bf = jnp.bfloat16
    wq, wk, wv, wo = (params[name].astype(bf) for name in ("wq", "wk", "wv", "wo"))
    w1, w2 = params["w1"].astype(bf), params["w2"].astype(bf)

    pm = pl.Buffered(1) if single_buffer_weights else None

    # ---- pass 1: norm1 + QKV projection ----
    qkv_grid = pltpu.PrefetchScalarGridSpec(
        num_scalar_prefetch=0,
        grid=(B, n_q),
        in_specs=[
            pl.BlockSpec((1, tq, dim), lambda b, i: (b, i, 0)),   # x tile
            _const_spec((1, dim), pm),                            # gamma1
            _const_spec((dim, dim), pm),                          # Wq^T (bf16)
            _const_spec((dim, dim), pm),                          # Wk^T (bf16)
            _const_spec((dim, dim), pm),                          # Wv^T (bf16)
        ],
        out_specs=[
            pl.BlockSpec((1, tq, dim), lambda b, i: (b, i, 0)),   # q (scaled, bf16)
            pl.BlockSpec((1, tq, dim), lambda b, i: (b, i, 0)),   # k cache (bf16)
            pl.BlockSpec((1, tq, dim), lambda b, i: (b, i, 0)),   # v cache (bf16)
        ],
    )
    q, kc, vc = pl.pallas_call(
        functools.partial(qkv_proj_kernel, scale=float(dh) ** -0.5),
        grid_spec=qkv_grid,
        out_shape=(jax.ShapeDtypeStruct((B, n_pad, dim), bf),) * 3,
        compiler_params=pltpu.CompilerParams(
            dimension_semantics=("parallel", "parallel"),
            vmem_limit_bytes=_vmem_limit(_est_qkv_vmem(tq, dim)),
        ),
    )(x, params["g1"], wq, wk, wv)

    # ---- pass 2: flash attention + Wo + norm2 + FF ----
    kv_idx = lambda b, qi, ki: (b, jnp.minimum(ki, qi), 0)   # clamp: no DMA for dead tiles
    attn_grid = pltpu.PrefetchScalarGridSpec(
        num_scalar_prefetch=0,
        grid=(B, n_q, n_q),
        in_specs=[
            pl.BlockSpec((1, tq, dim), lambda b, qi, ki: (b, qi, 0)),   # q tile
            pl.BlockSpec((1, tk, dim), kv_idx),                         # k tile
            pl.BlockSpec((1, tk, dim), kv_idx),                         # v tile
            _const_spec((1, dim), pm),                                  # gamma2
            _const_spec((dim, dim), pm),                                # Wo^T (bf16)
            _const_spec((dim, inner), pm),                              # W1^T (bf16)
            _const_spec((1, inner), pm),                                # b1
            _const_spec((inner, dim), pm),                              # W2^T (bf16)
            _const_spec((1, dim), pm),                                  # b2
        ],
        out_specs=pl.BlockSpec((1, tq, dim), lambda b, qi, ki: (b, qi, 0)),
        scratch_shapes=[
            pltpu.VMEM((heads, tq, 1), jnp.float32),   # running max per head
            pltpu.VMEM((heads, tq, 1), jnp.float32),   # running sum per head
            pltpu.VMEM((tq, dim), jnp.float32),        # per-head PV accum, (h d) layout
        ],
    )
    y = pl.pallas_call(
        functools.partial(attn_ff_kernel, heads=heads, tq=tq, tk=tk),
        grid_spec=attn_grid,
        out_shape=jax.ShapeDtypeStruct((B, n_pad, dim), jnp.float32),
        compiler_params=pltpu.CompilerParams(
            dimension_semantics=("parallel", "parallel", "arbitrary"),
            vmem_limit_bytes=_vmem_limit(_est_attn_vmem(tq, tk, dim, inner, heads)),
        ),
    )(q, kc, vc, params["g2"], wo, w1, params["b1"], w2, params["b2"])

    # Layout plumbing / dtype restore in the wrapper (cheap relative to the kernels).
    y = y[:, :n]
    kc = kc[:, :n].reshape(B, n, heads, dh).transpose(0, 2, 1, 3).astype(jnp.float32)
    vc = vc[:, :n].reshape(B, n, heads, dh).transpose(0, 2, 1, 3).astype(jnp.float32)
    return y, (kc, vc)


def dec_transformer_layer(x, params, *, heads):
    # Prefer single-buffered constant weight blocks (pl.Buffered(1)); fall back to
    # default double-buffering if this Pallas build rejects pipeline_mode here.
    try:
        return _dec_layer_impl(x, params, heads=heads, single_buffer_weights=True)
    except Exception:
        return _dec_layer_impl(x, params, heads=heads, single_buffer_weights=False)


# ---------------------------------------------------------------------------
# Reference, params, checks
# ---------------------------------------------------------------------------
def reference(x, params, *, heads):
    """Pure-JAX f32 reference mirroring the PyTorch forward (eval mode)."""
    B, n, dim = x.shape
    dh = dim // heads

    def ln(v, g):
        mu = v.mean(-1, keepdims=True)
        var = ((v - mu) ** 2).mean(-1, keepdims=True)
        return (v - mu) / jnp.sqrt(var + LN_EPS) * g

    xn = ln(x, params["g1"][0])
    q = xn @ params["wq"]
    k = xn @ params["wk"]
    v = xn @ params["wv"]
    resh = lambda t: t.reshape(B, n, heads, dh).transpose(0, 2, 1, 3)
    q, k, v = resh(q), resh(k), resh(v)
    dots = jnp.einsum("bhid,bhjd->bhij", q, k) * dh ** -0.5
    mask = jnp.triu(jnp.ones((n, n), bool), 1)
    dots = jnp.where(mask, -jnp.finfo(jnp.float32).max, dots)
    attn = jax.nn.softmax(dots, axis=-1)
    out = jnp.einsum("bhij,bhjd->bhid", attn, v)
    out = out.transpose(0, 2, 1, 3).reshape(B, n, dim) @ params["wo"]
    out = ln(out, params["g2"][0])
    h1 = out @ params["w1"] + params["b1"][0]
    h1 = 0.5 * h1 * (1.0 + jax.lax.erf(h1 / jnp.sqrt(2.0)))
    y = h1 @ params["w2"] + params["b2"][0]
    return y, (k, v)


def init_params(key, dim, heads, ff_inner_dim):
    ks = jax.random.split(key, 6)
    s = 0.1
    return {
        "g1": jnp.ones((1, dim), jnp.float32),            # LayerNorm gamma (beta=0 buffer)
        "wq": s * jax.random.normal(ks[0], (dim, dim), jnp.float32),
        "wk": s * jax.random.normal(ks[1], (dim, dim), jnp.float32),
        "wv": s * jax.random.normal(ks[2], (dim, dim), jnp.float32),
        "wo": s * jax.random.normal(ks[3], (dim, dim), jnp.float32),
        "g2": jnp.ones((1, dim), jnp.float32),
        "w1": s * jax.random.normal(ks[4], (dim, ff_inner_dim), jnp.float32),
        "b1": jnp.zeros((1, ff_inner_dim), jnp.float32),
        "w2": s * jax.random.normal(ks[5], (ff_inner_dim, dim), jnp.float32),
        "b2": jnp.zeros((1, dim), jnp.float32),
    }


def _check(name, got, want, atol=1e-1, rtol=1e-1, rel_rms=5e-2):
    # Kernel uses bf16 MXU operands (f32 accumulation) and an approx reciprocal in
    # the softmax denominator; compare at bf16-level tolerance.
    got, want = np.asarray(got), np.asarray(want)
    np.testing.assert_allclose(got, want, atol=atol, rtol=rtol, err_msg=name)
    rel = np.linalg.norm(got - want) / (np.linalg.norm(want) + 1e-12)
    assert rel < rel_rms, f"{name}: relative RMS error {rel:.4f} >= {rel_rms}"


if __name__ == "__main__":
    B, N, DIM, HEADS, FF_INNER = 2, 8, 32, 4, 64

    key = jax.random.PRNGKey(0)
    kx, kp = jax.random.split(key)
    x = jax.random.normal(kx, (B, N, DIM), jnp.float32)
    params = init_params(kp, DIM, HEADS, FF_INNER)

    y, (kc, vc) = dec_transformer_layer(x, params, heads=HEADS)
    jax.block_until_ready((y, kc, vc))

    y_ref, (k_ref, v_ref) = reference(x, params, heads=HEADS)
    _check("y", y, y_ref)
    _check("k_cache", kc, k_ref)
    _check("v_cache", vc, v_ref)

    print("KERNEL_OK")
</pallas_src>

<mosaic_0001>
module attributes {stable_mosaic.version = 11 : i64} {
  func.func @qkv_proj_kernel(%arg0: i32, %arg1: i32, %arg2: memref<1x8x32xf32, #tpu.memory_space<vmem>>, %arg3: memref<1x32xf32, #tpu.memory_space<vmem>>, %arg4: memref<32x32xbf16, #tpu.memory_space<vmem>>, %arg5: memref<32x32xbf16, #tpu.memory_space<vmem>>, %arg6: memref<32x32xbf16, #tpu.memory_space<vmem>>, %arg7: memref<1x8x32xbf16, #tpu.memory_space<vmem>>, %arg8: memref<1x8x32xbf16, #tpu.memory_space<vmem>>, %arg9: memref<1x8x32xbf16, #tpu.memory_space<vmem>>) attributes {dimension_semantics = [#tpu.dimension_semantics<parallel>, #tpu.dimension_semantics<parallel>], iteration_bounds = array<i64: 2, 1>, scalar_prefetch = 0 : i64, scratch_operands = 0 : i64, tpu.core_type = #tpu.core_type<tc>, window_params = [{transform_indices = @transform_0, window_bounds = array<i64: 1, 8, 32>}, {pipeline_mode = #tpu.pipeline_mode<synchronous>, transform_indices = @transform_1, window_bounds = array<i64: 1, 32>}, {pipeline_mode = #tpu.pipeline_mode<synchronous>, transform_indices = @transform_2, window_bounds = array<i64: 32, 32>}, {pipeline_mode = #tpu.pipeline_mode<synchronous>, transform_indices = @transform_3, window_bounds = array<i64: 32, 32>}, {pipeline_mode = #tpu.pipeline_mode<synchronous>, transform_indices = @transform_4, window_bounds = array<i64: 32, 32>}, {transform_indices = @transform_5, window_bounds = array<i64: 1, 8, 32>}, {transform_indices = @transform_6, window_bounds = array<i64: 1, 8, 32>}, {transform_indices = @transform_7, window_bounds = array<i64: 1, 8, 32>}]} {
    %c0 = arith.constant 0 : index
    %c0_0 = arith.constant 0 : index
    %c0_1 = arith.constant 0 : index
    %0 = vector.load %arg2[%c0, %c0_0, %c0_1] : memref<1x8x32xf32, #tpu.memory_space<vmem>>, vector<1x8x32xf32>
    %1 = vector.shape_cast %0 : vector<1x8x32xf32> to vector<8x32xf32>
    %c0_2 = arith.constant 0 : index
    %c0_3 = arith.constant 0 : index
    %2 = vector.load %arg3[%c0_2, %c0_3] : memref<1x32xf32, #tpu.memory_space<vmem>>, vector<1x32xf32>
    %cst = arith.constant dense<0.000000e+00> : vector<8xf32>
    %3 = vector.multi_reduction <add>, %1, %cst [1] : vector<8x32xf32> to vector<8xf32>
    %4 = vector.shape_cast %3 : vector<8xf32> to vector<8x1xf32>
    %cst_4 = arith.constant 3.200000e+01 : f32
    %5 = vector.broadcast %cst_4 : f32 to vector<8x1xf32>
    %6 = arith.divf %4, %5 : vector<8x1xf32>
    %7 = vector.broadcast %6 : vector<8x1xf32> to vector<8x32xf32>
    %8 = arith.subf %1, %7 : vector<8x32xf32>
    %9 = arith.mulf %8, %8 : vector<8x32xf32>
    %cst_5 = arith.constant dense<0.000000e+00> : vector<8xf32>
    %10 = vector.multi_reduction <add>, %9, %cst_5 [1] : vector<8x32xf32> to vector<8xf32>
    %11 = vector.shape_cast %10 : vector<8xf32> to vector<8x1xf32>
    %cst_6 = arith.constant 3.200000e+01 : f32
    %12 = vector.broadcast %cst_6 : f32 to vector<8x1xf32>
    %13 = arith.divf %11, %12 : vector<8x1xf32>
    %14 = vector.broadcast %6 : vector<8x1xf32> to vector<8x32xf32>
    %15 = arith.subf %1, %14 : vector<8x32xf32>
    %cst_7 = arith.constant 9.99999974E-6 : f32
    %16 = vector.broadcast %cst_7 : f32 to vector<8x1xf32>
    %17 = arith.addf %13, %16 : vector<8x1xf32>
    %18 = math.rsqrt %17 : vector<8x1xf32>
    %19 = vector.broadcast %18 : vector<8x1xf32> to vector<8x32xf32>
    %20 = arith.mulf %15, %19 : vector<8x32xf32>
    %21 = vector.broadcast %2 : vector<1x32xf32> to vector<8x32xf32>
    %22 = arith.mulf %20, %21 : vector<8x32xf32>
    %23 = arith.truncf %22 : vector<8x32xf32> to vector<8x32xbf16>
    %c0_8 = arith.constant 0 : index
    %c0_9 = arith.constant 0 : index
    %24 = vector.load %arg4[%c0_8, %c0_9] : memref<32x32xbf16, #tpu.memory_space<vmem>>, vector<32x32xbf16>
    %cst_10 = arith.constant dense<0.000000e+00> : vector<8x32xf32>
    %25 = tpu.matmul %23, %24, %cst_10 {dimension_numbers = #tpu.dot_dimension_numbers<[1], [0], [0], [1], [0, 0, 1, 1], [], []>} : vector<8x32xbf16>, vector<32x32xbf16>, vector<8x32xf32> -> vector<8x32xf32>
    %cst_11 = arith.constant 0.353553385 : f32
    %26 = vector.broadcast %cst_11 : f32 to vector<8x32xf32>
    %27 = arith.mulf %25, %26 : vector<8x32xf32>
    %28 = arith.truncf %27 : vector<8x32xf32> to vector<8x32xbf16>
    %c0_12 = arith.constant 0 : index
    %c0_13 = arith.constant 0 : index
    %c0_14 = arith.constant 0 : index
    %29 = vector.load %arg7[%c0_12, %c0_13, %c0_14] : memref<1x8x32xbf16, #tpu.memory_space<vmem>>, vector<1x8x32xbf16>
    %30 = vector.shape_cast %29 : vector<1x8x32xbf16> to vector<8x32xbf16>
    %31 = vector.shape_cast %28 : vector<8x32xbf16> to vector<1x8x32xbf16>
    tpu.vector_store %arg7[%c0_12, %c0_13, %c0_14], %31 {strides = array<i32>} : memref<1x8x32xbf16, #tpu.memory_space<vmem>>, vector<1x8x32xbf16>,
    %c0_15 = arith.constant 0 : index
    %c0_16 = arith.constant 0 : index
    %32 = vector.load %arg5[%c0_15, %c0_16] : memref<32x32xbf16, #tpu.memory_space<vmem>>, vector<32x32xbf16>
    %cst_17 = arith.constant dense<0.000000e+00> : vector<8x32xf32>
    %33 = tpu.matmul %23, %32, %cst_17 {dimension_numbers = #tpu.dot_dimension_numbers<[1], [0], [0], [1], [0, 0, 1, 1], [], []>} : vector<8x32xbf16>, vector<32x32xbf16>, vector<8x32xf32> -> vector<8x32xf32>
    %34 = arith.truncf %33 : vector<8x32xf32> to vector<8x32xbf16>
    %c0_18 = arith.constant 0 : index
    %c0_19 = arith.constant 0 : index
    %c0_20 = arith.constant 0 : index
    %35 = vector.load %arg8[%c0_18, %c0_19, %c0_20] : memref<1x8x32xbf16, #tpu.memory_space<vmem>>, vector<1x8x32xbf16>
    %36 = vector.shape_cast %35 : vector<1x8x32xbf16> to vector<8x32xbf16>
    %37 = vector.shape_cast %34 : vector<8x32xbf16> to vector<1x8x32xbf16>
    tpu.vector_store %arg8[%c0_18, %c0_19, %c0_20], %37 {strides = array<i32>} : memref<1x8x32xbf16, #tpu.memory_space<vmem>>, vector<1x8x32xbf16>,
    %c0_21 = arith.constant 0 : index
    %c0_22 = arith.constant 0 : index
    %38 = vector.load %arg6[%c0_21, %c0_22] : memref<32x32xbf16, #tpu.memory_space<vmem>>, vector<32x32xbf16>
    %cst_23 = arith.constant dense<0.000000e+00> : vector<8x32xf32>
    %39 = tpu.matmul %23, %38, %cst_23 {dimension_numbers = #tpu.dot_dimension_numbers<[1], [0], [0], [1], [0, 0, 1, 1], [], []>} : vector<8x32xbf16>, vector<32x32xbf16>, vector<8x32xf32> -> vector<8x32xf32>
    %40 = arith.truncf %39 : vector<8x32xf32> to vector<8x32xbf16>
    %c0_24 = arith.constant 0 : index
    %c0_25 = arith.constant 0 : index
    %c0_26 = arith.constant 0 : index
    %41 = vector.load %arg9[%c0_24, %c0_25, %c0_26] : memref<1x8x32xbf16, #tpu.memory_space<vmem>>, vector<1x8x32xbf16>
    %42 = vector.shape_cast %41 : vector<1x8x32xbf16> to vector<8x32xbf16>
    %43 = vector.shape_cast %40 : vector<8x32xbf16> to vector<1x8x32xbf16>
    tpu.vector_store %arg9[%c0_24, %c0_25, %c0_26], %43 {strides = array<i32>} : memref<1x8x32xbf16, #tpu.memory_space<vmem>>, vector<1x8x32xbf16>,
    return
  }
  func.func @transform_0(%arg0: i32, %arg1: i32) -> (i32, i32, i32) {
    %c0_i32 = arith.constant 0 : i32
    %c0_i32_0 = arith.constant 0 : i32
    return %arg0, %arg1, %c0_i32 : i32, i32, i32
  }
  func.func @transform_1(%arg0: i32, %arg1: i32) -> (i32, i32) {
    %c0_i32 = arith.constant 0 : i32
    %c0_i32_0 = arith.constant 0 : i32
    %c0_i32_1 = arith.constant 0 : i32
    return %c0_i32, %c0_i32_0 : i32, i32
  }
  func.func @transform_2(%arg0: i32, %arg1: i32) -> (i32, i32) {
    %c0_i32 = arith.constant 0 : i32
    %c0_i32_0 = arith.constant 0 : i32
    %c0_i32_1 = arith.constant 0 : i32
    return %c0_i32, %c0_i32_0 : i32, i32
  }
  func.func @transform_3(%arg0: i32, %arg1: i32) -> (i32, i32) {
    %c0_i32 = arith.constant 0 : i32
    %c0_i32_0 = arith.constant 0 : i32
    %c0_i32_1 = arith.constant 0 : i32
    return %c0_i32, %c0_i32_0 : i32, i32
  }
  func.func @transform_4(%arg0: i32, %arg1: i32) -> (i32, i32) {
    %c0_i32 = arith.constant 0 : i32
    %c0_i32_0 = arith.constant 0 : i32
    %c0_i32_1 = arith.constant 0 : i32
    return %c0_i32, %c0_i32_0 : i32, i32
  }
  func.func @transform_5(%arg0: i32, %arg1: i32) -> (i32, i32, i32) {
    %c0_i32 = arith.constant 0 : i32
    %c0_i32_0 = arith.constant 0 : i32
    return %arg0, %arg1, %c0_i32 : i32, i32, i32
  }
  func.func @transform_6(%arg0: i32, %arg1: i32) -> (i32, i32, i32) {
    %c0_i32 = arith.constant 0 : i32
    %c0_i32_0 = arith.constant 0 : i32
    return %arg0, %arg1, %c0_i32 : i32, i32, i32
  }
  func.func @transform_7(%arg0: i32, %arg1: i32) -> (i32, i32, i32) {
    %c0_i32 = arith.constant 0 : i32
    %c0_i32_0 = arith.constant 0 : i32
    return %arg0, %arg1, %c0_i32 : i32, i32, i32
  }
}

module attributes {stable_mosaic.version = 11 : i64} {
  func.func @qkv_proj_kernel(%arg0: i32, %arg1: i32, %arg2: memref<1x8x32xf32, #tpu.memory_space<vmem>>, %arg3: memref<1x32xf32, #tpu.memory_space<vmem>>, %arg4: memref<32x32xbf16, #tpu.memory_space<vmem>>, %arg5: memref<32x32xbf16, #tpu.memory_space<vmem>>, %arg6: memref<32x32xbf16, #tpu.memory_space<vmem>>, %arg7: memref<1x8x32xbf16, #tpu.memory_space<vmem>>, %arg8: memref<1x8x32xbf16, #tpu.memory_space<vmem>>, %arg9: memref<1x8x32xbf16, #tpu.memory_space<vmem>>) attributes {dimension_semantics = [#tpu.dimension_semantics<parallel>, #tpu.dimension_semantics<parallel>], iteration_bounds = array<i64: 2, 1>, scalar_prefetch = 0 : i64, scratch_operands = 0 : i64, tpu.core_type = #tpu.core_type<tc>, window_params = [{transform_indices = @transform_0, window_bounds = array<i64: 1, 8, 32>}, {pipeline_mode = #tpu.pipeline_mode<synchronous>, transform_indices = @transform_1, window_bounds = array<i64: 1, 32>}, {pipeline_mode = #tpu.pipeline_mode<synchronous>, transform_indices = @transform_2, window_bounds = array<i64: 32, 32>}, {pipeline_mode = #tpu.pipeline_mode<synchronous>, transform_indices = @transform_3, window_bounds = array<i64: 32, 32>}, {pipeline_mode = #tpu.pipeline_mode<synchronous>, transform_indices = @transform_4, window_bounds = array<i64: 32, 32>}, {transform_indices = @transform_5, window_bounds = array<i64: 1, 8, 32>}, {transform_indices = @transform_6, window_bounds = array<i64: 1, 8, 32>}, {transform_indices = @transform_7, window_bounds = array<i64: 1, 8, 32>}]} {
    %c0 = arith.constant 0 : index
    %c0_0 = arith.constant 0 : index
    %c0_1 = arith.constant 0 : index
    %0 = vector.load %arg2[%c0, %c0_0, %c0_1] : memref<1x8x32xf32, #tpu.memory_space<vmem>>, vector<1x8x32xf32>
    %1 = vector.shape_cast %0 : vector<1x8x32xf32> to vector<8x32xf32>
    %c0_2 = arith.constant 0 : index
    %c0_3 = arith.constant 0 : index
    %2 = vector.load %arg3[%c0_2, %c0_3] : memref<1x32xf32, #tpu.memory_space<vmem>>, vector<1x32xf32>
    %cst = arith.constant dense<0.000000e+00> : vector<8xf32>
    %3 = vector.multi_reduction <add>, %1, %cst [1] : vector<8x32xf32> to vector<8xf32>
    %4 = vector.shape_cast %3 : vector<8xf32> to vector<8x1xf32>
    %cst_4 = arith.constant 3.200000e+01 : f32
    %5 = vector.broadcast %cst_4 : f32 to vector<8x1xf32>
    %6 = arith.divf %4, %5 : vector<8x1xf32>
    %7 = vector.broadcast %6 : vector<8x1xf32> to vector<8x32xf32>
    %8 = arith.subf %1, %7 : vector<8x32xf32>
    %9 = arith.mulf %8, %8 : vector<8x32xf32>
    %cst_5 = arith.constant dense<0.000000e+00> : vector<8xf32>
    %10 = vector.multi_reduction <add>, %9, %cst_5 [1] : vector<8x32xf32> to vector<8xf32>
    %11 = vector.shape_cast %10 : vector<8xf32> to vector<8x1xf32>
    %cst_6 = arith.constant 3.200000e+01 : f32
    %12 = vector.broadcast %cst_6 : f32 to vector<8x1xf32>
    %13 = arith.divf %11, %12 : vector<8x1xf32>
    %14 = vector.broadcast %6 : vector<8x1xf32> to vector<8x32xf32>
    %15 = arith.subf %1, %14 : vector<8x32xf32>
    %cst_7 = arith.constant 9.99999974E-6 : f32
    %16 = vector.broadcast %cst_7 : f32 to vector<8x1xf32>
    %17 = arith.addf %13, %16 : vector<8x1xf32>
    %18 = math.rsqrt %17 : vector<8x1xf32>
    %19 = vector.broadcast %18 : vector<8x1xf32> to vector<8x32xf32>
    %20 = arith.mulf %15, %19 : vector<8x32xf32>
    %21 = vector.broadcast %2 : vector<1x32xf32> to vector<8x32xf32>
    %22 = arith.mulf %20, %21 : vector<8x32xf32>
    %23 = arith.truncf %22 : vector<8x32xf32> to vector<8x32xbf16>
    %c0_8 = arith.constant 0 : index
    %c0_9 = arith.constant 0 : index
    %24 = vector.load %arg4[%c0_8, %c0_9] : memref<32x32xbf16, #tpu.memory_space<vmem>>, vector<32x32xbf16>
    %cst_10 = arith.constant dense<0.000000e+00> : vector<8x32xf32>
    %25 = tpu.matmul %23, %24, %cst_10 {dimension_numbers = #tpu.dot_dimension_numbers<[1], [0], [0], [1], [0, 0, 1, 1], [], []>} : vector<8x32xbf16>, vector<32x32xbf16>, vector<8x32xf32> -> vector<8x32xf32>
    %cst_11 = arith.constant 0.353553385 : f32
    %26 = vector.broadcast %cst_11 : f32 to vector<8x32xf32>
    %27 = arith.mulf %25, %26 : vector<8x32xf32>
    %28 = arith.truncf %27 : vector<8x32xf32> to vector<8x32xbf16>
    %c0_12 = arith.constant 0 : index
    %c0_13 = arith.constant 0 : index
    %c0_14 = arith.constant 0 : index
    %29 = vector.load %arg7[%c0_12, %c0_13, %c0_14] : memref<1x8x32xbf16, #tpu.memory_space<vmem>>, vector<1x8x32xbf16>
    %30 = vector.shape_cast %29 : vector<1x8x32xbf16> to vector<8x32xbf16>
    %31 = vector.shape_cast %28 : vector<8x32xbf16> to vector<1x8x32xbf16>
    tpu.vector_store %arg7[%c0_12, %c0_13, %c0_14], %31 {strides = array<i32>} : memref<1x8x32xbf16, #tpu.memory_space<vmem>>, vector<1x8x32xbf16>,
    %c0_15 = arith.constant 0 : index
    %c0_16 = arith.constant 0 : index
    %32 = vector.load %arg5[%c0_15, %c0_16] : memref<32x32xbf16, #tpu.memory_space<vmem>>, vector<32x32xbf16>
    %cst_17 = arith.constant dense<0.000000e+00> : vector<8x32xf32>
    %33 = tpu.matmul %23, %32, %cst_17 {dimension_numbers = #tpu.dot_dimension_numbers<[1], [0], [0], [1], [0, 0, 1, 1], [], []>} : vector<8x32xbf16>, vector<32x32xbf16>, vector<8x32xf32> -> vector<8x32xf32>
    %34 = arith.truncf %33 : vector<8x32xf32> to vector<8x32xbf16>
    %c0_18 = arith.constant 0 : index
    %c0_19 = arith.constant 0 : index
    %c0_20 = arith.constant 0 : index
    %35 = vector.load %arg8[%c0_18, %c0_19, %c0_20] : memref<1x8x32xbf16, #tpu.memory_space<vmem>>, vector<1x8x32xbf16>
    %36 = vector.shape_cast %35 : vector<1x8x32xbf16> to vector<8x32xbf16>
    %37 = vector.shape_cast %34 : vector<8x32xbf16> to vector<1x8x32xbf16>
    tpu.vector_store %arg8[%c0_18, %c0_19, %c0_20], %37 {strides = array<i32>} : memref<1x8x32xbf16, #tpu.memory_space<vmem>>, vector<1x8x32xbf16>,
    %c0_21 = arith.constant 0 : index
    %c0_22 = arith.constant 0 : index
    %38 = vector.load %arg6[%c0_21, %c0_22] : memref<32x32xbf16, #tpu.memory_space<vmem>>, vector<32x32xbf16>
    %cst_23 = arith.constant dense<0.000000e+00> : vector<8x32xf32>
    %39 = tpu.matmul %23, %38, %cst_23 {dimension_numbers = #tpu.dot_dimension_numbers<[1], [0], [0], [1], [0, 0, 1, 1], [], []>} : vector<8x32xbf16>, vector<32x32xbf16>, vector<8x32xf32> -> vector<8x32xf32>
    %40 = arith.truncf %39 : vector<8x32xf32> to vector<8x32xbf16>
    %c0_24 = arith.constant 0 : index
    %c0_25 = arith.constant 0 : index
    %c0_26 = arith.constant 0 : index
    %41 = vector.load %arg9[%c0_24, %c0_25, %c0_26] : memref<1x8x32xbf16, #tpu.memory_space<vmem>>, vector<1x8x32xbf16>
    %42 = vector.shape_cast %41 : vector<1x8x32xbf16> to vector<8x32xbf16>
    %43 = vector.shape_cast %40 : vector<8x32xbf16> to vector<1x8x32xbf16>
    tpu.vector_store %arg9[%c0_24, %c0_25, %c0_26], %43 {strides = array<i32>} : memref<1x8x32xbf16, #tpu.memory_space<vmem>>, vector<1x8x32xbf16>,
    return
  }
  func.func @transform_0(%arg0: i32, %arg1: i32) -> (i32, i32, i32) {
    %c0_i32 = arith.constant 0 : i32
    %c0_i32_0 = arith.constant 0 : i32
    return %arg0, %arg1, %c0_i32 : i32, i32, i32
  }
  func.func @transform_1(%arg0: i32, %arg1: i32) -> (i32, i32) {
    %c0_i32 = arith.constant 0 : i32
    %c0_i32_0 = arith.constant 0 : i32
    %c0_i32_1 = arith.constant 0 : i32
    return %c0_i32, %c0_i32_0 : i32, i32
  }
  func.func @transform_2(%arg0: i32, %arg1: i32) -> (i32, i32) {
    %c0_i32 = arith.constant 0 : i32
    %c0_i32_0 = arith.constant 0 : i32
    %c0_i32_1 = arith.constant 0 : i32
    return %c0_i32, %c0_i32_0 : i32, i32
  }
  func.func @transform_3(%arg0: i32, %arg1: i32) -> (i32, i32) {
    %c0_i32 = arith.constant 0 : i32
    %c0_i32_0 = arith.constant 0 : i32
    %c0_i32_1 = arith.constant 0 : i32
    return %c0_i32, %c0_i32_0 : i32, i32
  }
  func.func @transform_4(%arg0: i32, %arg1: i32) -> (i32, i32) {
    %c0_i32 = arith.constant 0 : i32
    %c0_i32_0 = arith.constant 0 : i32
    %c0_i32_1 = arith.constant 0 : i32
    return %c0_i32, %c0_i32_0 : i32, i32
  }
  func.func @transform_5(%arg0: i32, %arg1: i32) -> (i32, i32, i32) {
    %c0_i32 = arith.constant 0 : i32
    %c0_i32_0 = arith.constant 0 : i32
    return %arg0, %arg1, %c0_i32 : i32, i32, i32
  }
  func.func @transform_6(%arg0: i32, %arg1: i32) -> (i32, i32, i32) {
    %c0_i32 = arith.constant 0 : i32
    %c0_i32_0 = arith.constant 0 : i32
    return %arg0, %arg1, %c0_i32 : i32, i32, i32
  }
  func.func @transform_7(%arg0: i32, %arg1: i32) -> (i32, i32, i32) {
    %c0_i32 = arith.constant 0 : i32
    %c0_i32_0 = arith.constant 0 : i32
    return %arg0, %arg1, %c0_i32 : i32, i32, i32
  }
}

</mosaic_0001>

<bundles_post_ra>
// kernel: tpu_custom_call.1
= control target key start
LH: loop header
LB: loop body
LE: loop exit
PB: predicated region body
PF: predicated region fallthrough
CT: control target
= control target key end

     0   :  { %s1580_s0 = inlined_call_operand.hbm [shape: f32[2,8,32], index: 0, kind: input, shape index: {}]   ;;  %s1581_s1 = inlined_call_operand.vmem [shape: f32[1,32], index: 1, kind: input, shape index: {}]   ;;  %s1582_s2 = inlined_call_operand.hbm [shape: bf16[32,32], index: 2, kind: input, shape index: {}]   ;;  %s1583_s3 = inlined_call_operand.hbm [shape: bf16[32,32], index: 3, kind: input, shape index: {}]   ;;  %s1584_s4 = inlined_call_operand.hbm [shape: bf16[32,32], index: 4, kind: input, shape index: {}]   ;;  %s1585_s5 = inlined_call_operand.hbm [shape: bf16[2,8,32], index: 5, kind: output, shape index: {0}]   ;;  %s1586_s6 = inlined_call_operand.hbm [shape: bf16[2,8,32], index: 6, kind: output, shape index: {1}]   ;;  %s1587_s7 = inlined_call_operand.hbm [shape: bf16[2,8,32], index: 7, kind: output, shape index: {2}]  }
   0x1   :  { %1592 = sst [smem:[#allocation19_spill]] %s1582_s2 }
   0x2   :  { %1593 = sst [smem:[#allocation20_spill]] %s1583_s3 }
   0x3   :  { %1594 = sst [smem:[#allocation21_spill]] %s1584_s4 }
   0x4   :  { %13 = vsyncpa [#allocation3], 0 }
   0x5   :  { %15 = vsyncpa [#allocation3 + $0x1], 0 }
   0x6   :  { %16 = vsyncpa [#allocation6], 0 }
   0x7   :  { %17 = vsyncpa [#allocation9], 0 }
   0x8   :  { %18 = vsyncpa [#allocation4], 0 }
   0x9   :  { %20 = vsyncpa [#allocation4 + $0x1], 0 }
   0xa   :  { %21 = vsyncpa [#allocation12], 0 }
   0xb   :  { %23 = vsyncpa [#allocation12 + $0x1], 0  ;;  %s1293_s24 = smov 0   ;;  %s1295_s25 = smov 0  }
   0xc   :  { %s1297_s26 = smov 0   ;;  %s1299_s27 = smov 0  }
   0xd   :  { %s1301_s28 = smov 0   ;;  %s1303_s29 = smov 0  }
   0xe LB: > { %s1324_s30 = sadd.s32 4294967295, %s1240_s29   ;;  %s1590_s8 = sadd.s32 4294967294, %s1240_s29   ;;  %s1240_s29 = sphi %s1303_s29, %s29_s29   ;;  %s1236_s28 = sphi %s1301_s28, %s1618_s28   ;;  %s1232_s27 = sphi %s1299_s27, %s1617_s27   ;;  %s1228_s26 = sphi %s1297_s26, %s1616_s26   ;;  %s1224_s25 = sphi %s1295_s25, %s1615_s25   ;;  %s1220_s24 = sphi %s1293_s24, %s1614_s24  }
   0xf   : > { %p63_p0 = scmp.ne.s32.totalorder %s1224_s25, %s1220_s24  ;;  %p1588_p1 = scmp.eq.s32.totalorder %s1324_s30, 0 }
  0x10   : > { %p179_p3 = scmp.eq.s32.totalorder %s1590_s8, 1  ;;  %p809_p5 = scmp.ge.s32.totalorder %s1240_s29, 1 }
  0x11   : > { %p1335_p4 = por %p1588_p1, %p63_p0  ;;  %p242_p7 = scmp.lt.s32.totalorder %s1240_s29, 3 }
  0x12   : > { %p1340_p6 = por %p179_p3, %p63_p0  ;;  %s1242_s12 = smov [#allocation5]  }
  0x13   : > { %s1595_s9 = scalar_select %p1335_p4, 1, 0 }
  0x14   : > { %s1596_s10 = scalar_select %p1340_p6, 1, 0 }
  0x15   : > { %p1345_p8 = pnand %p809_p5, %p242_p7  ;;  %s257_s13 = sshll.u32 %s1242_s12, 4  ;;  %s258_s13 = int_to_ptr.vmem [resolvable:$true] %s257_s13 }
  0x16   : > { %s1243_s15 = smov [#allocation7]   ;;  %s1244_s17 = smov [#allocation8]  }
  0x17   : > { %p895_p9 = pneg %p1345_p8  ;;  %s270_s16 = sshll.u32 %s1243_s15, 4  ;;  %s271_s16 = int_to_ptr.vmem [resolvable:$true] %s270_s16 }
  0x18   : > { %s283_s18 = sshll.u32 %s1244_s17, 4  ;;  %s1001_s19 = scalar_lea.vmem %s258_s13, 256  ;;  %s284_s18 = int_to_ptr.vmem [resolvable:$true] %s283_s18 }
  0x19   : > { %p1354_p11 = pnand %p895_p9, %p1588_p1  ;;  %p1002_p13 = scmp.ne.s32.totalorder %s258_s13, %s1001_s19 }
  0x1a   : > { %p1009_p5 = scmp.lt.s32.totalorder %s258_s13, %s258_s13  ;;  %p1010_p7 = scmp.lt.s32.totalorder %s1001_s19, %s1001_s19 }
  0x1b   : > { %p992_p12 = pneg %p1354_p11 }
  0x1c   : > { %p1011_p9 = por %p1010_p7, %p1009_p5 }
  0x1d   : > { %p1004_p0 = pnand %p1002_p13, %p992_p12 }
  0x1f   : > { %p1005_p3 = pneg %p1004_p0 }
  0x21   : > { %p1012_p10 = pnand %p1011_p9, %p1005_p3 }
  0x23   : > { %1015 = shalt.err (!%p1012_p10)
}
  0x24   : > { %s1245_s20 = smov 64   ;;  %s1246_s21 = smov 4  }
  0x25   : > { %s1599_s2 = sld [smem:[#allocation19_spill]]  ;;  %s1027_s12 = scalar_lea.vmem %s271_s16, 256 }
  0x26   : > { %p1028_p1 = scmp.ne.s32.totalorder %s271_s16, %s1027_s12  ;;  %p1035_p2 = scmp.lt.s32.totalorder %s271_s16, %s271_s16 }
  0x27   : > { %p1036_p6 = scmp.lt.s32.totalorder %s1027_s12, %s1027_s12 }
  0x28   : > { %p1030_p13 = pnand %p1028_p1, %p992_p12 }
  0x29   : > { %p1037_p5 = por %p1036_p6, %p1035_p2 }
  0x2a   : > { %p1031_p0 = pneg %p1030_p13 }
  0x2b   : > { %898 = dma.hbm_to_vmem [thread:$0]  (!%p1354_p11), %s1599_s2, 256, %s258_s13, [#allocation6], %s1245_s20, %s1245_s20, %s1246_s21  }
  0x2c   : > { %p1038_p3 = pnand %p1037_p5, %p1031_p0 }
  0x2e   : > { %1041 = shalt.err (!%p1038_p3)
}
  0x2f   : > { %s1600_s3 = sld [smem:[#allocation20_spill]]  ;;  %s1053_s13 = scalar_lea.vmem %s284_s18, 256 }
  0x30   : > { %p1054_p10 = scmp.ne.s32.totalorder %s284_s18, %s1053_s13  ;;  %p1061_p9 = scmp.lt.s32.totalorder %s284_s18, %s284_s18 }
  0x31   : > { %p1062_p13 = scmp.lt.s32.totalorder %s1053_s13, %s1053_s13 }
  0x32   : > { %p1056_p7 = pnand %p1054_p10, %p992_p12 }
  0x33   : > { %p1063_p4 = por %p1062_p13, %p1061_p9 }
  0x34   : > { %p1057_p1 = pneg %p1056_p7 }
  0x35   : > { %901 = dma.hbm_to_vmem [thread:$0]  (!%p1354_p11), %s1600_s3, 256, %s271_s16, [#allocation6], %s1245_s20, %s1245_s20, %s1246_s21  }
  0x36   : > { %p1064_p2 = pnand %p1063_p4, %p1057_p1 }
  0x38   : > { %1067 = shalt.err (!%p1064_p2)
}
  0x39   : > { %s1601_s4 = sld [smem:[#allocation21_spill]]  ;;  %s50_s16 = sadd.s32 1, %s1228_s26 }
  0x3a   : > { %s41_s23 = sadd.s32 1, %s1236_s28  ;;  %p57_p4 = scmp.ne.s32.totalorder %s1228_s26, %s1224_s25 }
  0x3b   : > { %p43_p6 = scmp.ge.s32.totalorder %s41_s23, 2  ;;  %p58_p12 = scmp.eq.s32.totalorder %s1240_s29, 0 }
  0x3c   : > { %p1602_p0 = scmp.eq.s32.totalorder %s1324_s30, 1  ;;  %p922_p3 = scmp.lt.s32.totalorder %s1240_s29, 2 }
  0x3d   : > { %s1620_s23 = smov (%p43_p6, %s41_s23), 0  ;;  %p59_p10 = por %p58_p12, %p57_p4 }
  0x3e   : > { %p1391_p5 = por %p1602_p0, %p57_p4  ;;  %s297_s12 = sand.u32 1, %s1228_s26  }
  0x3f   : > { %904 = dma.hbm_to_vmem [thread:$0]  (!%p1354_p11), %s1601_s4, 256, %s284_s18, [#allocation9], %s1245_s20, %s1245_s20, %s1246_s21  }
  0x40   : > { %s45_s15 = ssub.s32 %s1236_s28, %s1620_s23  ;;  %s814_s18 = sshll.u32 %s297_s12, 3 }
  0x41   : > { %p48_p7 = scmp.eq.s32.totalorder %s45_s15, 0  ;;  %s815_s20 = sshll.u32 %s1236_s28, 7 }
  0x42   : > { %s307_s19 = scalar_lea.hbm %s1580_s0, %s815_s20  ;;  %s301_s22 = scalar_lea.vmem [#allocation2], %s814_s18 }
  0x43   : > { %s1403_s21 = scalar_select %p48_p7, %s1228_s26, %s50_s16  }
  0x44   : > { %s309_s8 = sshll.u32 %s301_s22, 4  ;;  %p1410_p11 = pnand %p922_p3, %p59_p10  ;;  %s310_s8 = int_to_ptr.vmem [resolvable:$true] %s309_s8 }
  0x45   : > { %s298_s3 = scalar_lea.sflag [#allocation3], %s297_s12  ;;  %s1081_s15 = scalar_lea.vmem %s310_s8, 128 }
  0x46   : > { %p1070_p1 = pneg %p1410_p11  ;;  %p1082_p9 = scmp.ne.s32.totalorder %s310_s8, %s1081_s15 }
  0x47   : > { %s1247_s16 = smov [#allocation2]  }
  0x48   : > { %p1084_p13 = pnand %p1082_p9, %p1070_p1  ;;  %s1086_s4 = sshll.u32 %s1247_s16, 4  ;;  %s1087_s4 = int_to_ptr.vmem [resolvable:$false] %s1086_s4 }
  0x49   : > { %s1088_s20 = scalar_lea.vmem %s1087_s4, 256  ;;  %p1089_p4 = scmp.lt.s32.totalorder %s310_s8, %s1087_s4 }
  0x4a   : > { %p1085_p2 = pneg %p1084_p13  ;;  %p1090_p6 = scmp.lt.s32.totalorder %s1088_s20, %s1081_s15 }
  0x4c   : > { %p1091_p12 = por %p1090_p6, %p1089_p4 }
  0x4e   : > { %p1092_p0 = pnand %p1091_p12, %p1085_p2 }
  0x50   : > { %1095 = shalt.err (!%p1092_p0)
}
  0x51   : > { %908 = dma.hbm_to_vmem [thread:$0]  (!%p1410_p11), %s307_s19, 128, %s310_s8, %s298_s3  }
  0x52   : > { %318 = sbr.rel (%p1345_p8) target bundleno = 663 (0x297), region = 40  ;;  %s1421_s12 = sand.u32 (!%p1345_p8), 1, %s1224_s25  }
  0x53   : > { %s817_s18 = sshll.u32 (!%p1345_p8), %s1421_s12, 3  ;;  %s321_s17 = scalar_lea.sflag (!%p1345_p8), [#allocation3], %s1421_s12 }
  0x54   : > { %s324_s13 = scalar_lea.vmem (!%p1345_p8), [#allocation2], %s817_s18  ;;  %p1605_p3 = scmp.ne.s32.totalorder (!%p1345_p8), %s1595_s9, 0 }
  0x57   : > { %1199 = dma.done.wait (%p1605_p3), %s321_s17, 128  }
  0x58   : > { %1201 = vsyncadd (%p1605_p3), %s321_s17, 4294967168  ;;  %p1606_p10 = scmp.eq.s32.totalorder %s1324_s30, 0 }
  0x5a   : > { %1203 = dma.done.wait (%p1606_p10), [#allocation6], 512   ;;  %p1607_p7 = pmov %p1606_p10 }
  0x5c   : > { %1205 = vsyncadd (%p1607_p7), [#allocation6], 4294966784  ;;  %p1608_p8 = pmov %p1607_p7 }
  0x5d   : > { %p1609_p11 = pmov %p1607_p7 }
  0x5e   : > { %1207 = dma.done.wait (%p1608_p8), [#allocation9], 256  }
  0x5f   : > { %1209 = vsyncadd (%p1609_p11), [#allocation9], 4294967040  ;;  %vm380_vm0 = vcmask 261120   ;;  %v378_v0 = vld [vmem:[%s324_s13] sm:$0xff]  ;;  %v982_v7 = vld [vmem:[#allocation5 + $0x8] sm:$0xff]   ;;  %v1248_v9 = vmov 0.0  }
  0x60   : > { %v381_v1 = vsel %vm380_vm0, %v378_v0, 0.0  ;;  %v983_v8 = vld [vmem:[#allocation7 + $0x8] sm:$0xff]   ;;  %851 = vmatprep.subr.bf16.mxu0 %v1248_v9  ;;  %859 = vmatprep.subr.bf16.mxu1 %v1248_v9  ;;  %v984_v10 = vld [vmem:[#allocation5] sm:$0xff]   ;;  %v985_v11 = vld [vmem:[#allocation7] sm:$0xff]   ;;  %vm1249_vm1 = vmmov 0   ;;  %s1449_s4 = sshll.u32 %s1421_s12, 2 }
  0x61   : > { %382 = vadd.xlane.f32.xlu0 %v381_v1  ;;  %852 = vmatpush3.bf16.msra.mxu0 %v982_v7  ;;  %v824_v16 = vld [vmem:[%s1581_s1] ss:$0 sm:$0xff]  ;;  %v986_v19 = vld [vmem:[#allocation8 + $0x8] sm:$0xff]   ;;  %v987_v21 = vld [vmem:[#allocation8] sm:$0xff]   ;;  %s587_s8 = sand.u32 1, %s1324_s30   ;;  %s1453_s9 = sshll.u32 %s1232_s27, 6 }
  0x62   : > { %860 = vmatpush3.bf16.msra.mxu1 %v983_v8  ;;  %853 = vmatprep.subr.bf16.mxu0 %v1248_v9  ;;  %s369_s11 = scalar_lea.vmem [#allocation11], %s1449_s4  ;;  %vm464_vm2 = vcmask 257024   ;;  %s1591_s22 = scalar_lea.vmem [#allocation10], %s1449_s4 }
  0x63   : > { %861 = vmatprep.subr.bf16.mxu1 %v1248_v9  ;;  %855 = vmatprep.mubr.msk.bf16.mxu0 %vm1249_vm1, %v1248_v9  ;;  %s621_s19 = sshll.u32 %s369_s11, 4  ;;  %s607_s15 = sshll.u32 %s1591_s22, 4  ;;  %s1465_s19 = int_to_ptr.vmem [resolvable:$true] %s621_s19  ;;  %s1474_s15 = int_to_ptr.vmem [resolvable:$true] %s607_s15 }
  0x64   : > { %863 = vmatprep.mubr.msk.bf16.mxu1 %vm1249_vm1, %v1248_v9  ;;  %s1463_s18 = scalar_lea.hbm %s1586_s6, %s1453_s9  ;;  %s1472_s17 = scalar_lea.hbm %s1585_s5, %s1453_s9 }
  0x65   : > { %854 = vmatpush3.bf16.msra.mxu0 %v984_v10  ;;  %s1476_s13 = scalar_lea.sflag [#allocation12], %s587_s8  ;;  %s1096_s2 = scalar_lea.vmem %s1465_s19, 64 }
  0x66   : > { %862 = vmatpush3.bf16.msra.mxu1 %v985_v11  ;;  %867 = vmatprep.subr.bf16.mxu0 %v1248_v9  ;;  %p1097_p1 = scmp.ne.s32.totalorder %s1465_s19, %s1096_s2  ;;  %s1250_s3 = smov [#allocation11]  }
  0x67   : > { %s1100_s16 = sshll.u32 %s1250_s3, 4  ;;  %s1101_s16 = int_to_ptr.vmem [resolvable:$false] %s1100_s16 }
  0x68   : > { %p1098_p9 = pnand %p1097_p1, %p1391_p5  ;;  %p1103_p2 = scmp.lt.s32.totalorder %s1465_s19, %s1101_s16 }
  0x6a   : > { %p1099_p13 = pneg %p1098_p9 }
  0xea   : > { %v383_v2 = vpop.xlane.xlu0 %382 }
  0xeb   : > { %v385_v3 = vmul.f32 0.03125, %v383_v2 }
  0xed   : > { %v386_v4 = vsub.f32 %v378_v0, %v385_v3 }
  0xef   : > { %v387_v5 = vmul.f32 %v386_v4, %v386_v4 }
  0xf1   : > { %v388_v6 = vsel %vm380_vm0, %v387_v5, 0.0 }
  0xf2   : > { %389 = vadd.xlane.f32.xlu0 %v388_v6 }
 0x17b   : > { %v390_v12 = vpop.xlane.xlu0 %389 }
 0x17c   : > { %v391_v13 = vmul.f32 0.03125, %v390_v12 }
 0x17e   : > { %v392_v14 = vadd.f32 1e-05, %v391_v13 }
 0x180   : > { %988 = vrsqrt.f32 %v392_v14 }
 0x18d   : > { %v989_v15 = vpop.eup %988 }
 0x18e   : > { %v394_v17 = vmul.f32 %v989_v15, %v386_v4 }
 0x190   : > { %v401_v18 = vmul.f32 %v824_v16, %v394_v17 }
 0x192   : > { %v402_v20 = vpack.c.bf16 %v401_v18, %v401_v18 }
 0x194   : > { %856 = vmatmul.mubr.msk.bf16.vlgmr.msra.gmra.mxu0 %vm380_vm0, %v402_v20  ;;  %864 = vmatmul.mubr.msk.bf16.vlgmr.msra.gmra.mxu1 %vm380_vm0, %v402_v20 }
 0x195   : > { %868 = vmatpush3.bf16.msra.mxu0 %v986_v19  ;;  %871 = vmatprep.mubr.msk.bf16.mxu0 %vm1249_vm1, %v1248_v9 }
 0x196   : > { %869 = vmatprep.subr.bf16.mxu0 %v1248_v9 }
 0x199   : > { %870 = vmatpush3.bf16.msra.mxu0 %v987_v21 }
 0x19c   : > { %872 = vmatmul.mubr.msk.bf16.vlgmr.msra.gmra.mxu0 %vm380_vm0, %v402_v20 }
 0x254   : > { %v456_v22 = vpop.f32.mrf.mxu0  ;;  %v516_v23 = vpop.f32.mrf.mxu1 }
 0x255   : > { %v462_v24 = vmul.f32 0.35355338, %v456_v22  ;;  %v522_v25 = vpack.c.bf16 %v516_v23, %v516_v23 }
 0x256   : > { %v857_v26 = vpop.f32.mrf.mxu0  ;;  %v865_v27 = vpop.f32.mrf.mxu1 }
 0x257   : > { %v463_v28 = vpack.c.bf16 %v462_v24, %v462_v24  ;;  %523 = vst.msk [vmem:[%s369_s11] sm:$0xf] %vm464_vm2, %v522_v25  ;;  %s1102_s11 = scalar_lea.vmem %s1101_s16, 128 }
 0x258   : > { %v459_v29 = vpop.f32.mrf.mxu0  ;;  %v519_v30 = vpop.f32.mrf.mxu1  ;;  %p1104_p4 = scmp.lt.s32.totalorder %s1102_s11, %s1096_s2 }
 0x25a   : > { %p1105_p6 = por %p1104_p4, %p1103_p2 }
 0x25c   : > { %p1106_p12 = pnand %p1105_p6, %p1099_p13 }
 0x25e   : > { %1109 = shalt.err (!%p1106_p12)
}
 0x25f   : > { %s1110_s8 = scalar_lea.hbm %s1463_s18, 64  ;;  %s1114_s30 = scalar_lea.hbm %s1586_s6, 128 }
 0x260   : > { %p1111_p0 = scmp.ne.s32.totalorder %s1463_s18, %s1110_s8  ;;  %p1115_p7 = scmp.lt.s32.totalorder %s1463_s18, %s1586_s6 }
 0x261   : > { %p1116_p8 = scmp.lt.s32.totalorder %s1114_s30, %s1110_s8 }
 0x262   : > { %p1112_p3 = pnand %p1111_p0, %p1391_p5 }
 0x263   : > { %p1117_p11 = por %p1116_p8, %p1115_p7 }
 0x264   : > { %p1113_p10 = pneg %p1112_p3 }
 0x266   : > { %p1118_p1 = pnand %p1117_p11, %p1113_p10 }
 0x268   : > { %1121 = shalt.err (!%p1118_p1)
}
 0x269   : > { %890 = dma.vmem_to_hbm [thread:$0]  (%p1391_p5), %s1465_s19, 64, %s1463_s18, %s1476_s13   ;;  %v858_v31 = vpop.f32.mrf.mxu0  ;;  %v866_v32 = vpop.f32.mrf.mxu1 }
 0x26a   : > { %s1610_s22 = scalar_lea.vmem [#allocation10], %s1449_s4  ;;  %s376_s2 = scalar_lea.vmem [#allocation13], %s1449_s4 }
 0x26b   : > { %465 = vst.msk [vmem:[%s1610_s22] sm:$0xf] %vm464_vm2, %v463_v28  ;;  %s1505_s16 = sshll.u32 %s376_s2, 4  ;;  %s583_s11 = scalar_lea.sflag [#allocation4], %s1421_s12  ;;  %s636_s16 = int_to_ptr.vmem [resolvable:$true] %s1505_s16 }
 0x26c   : > { %s1122_s8 = scalar_lea.vmem %s1474_s15, 64  ;;  %s1251_s20 = smov [#allocation10]  }
 0x26d   : > { %p1123_p9 = scmp.ne.s32.totalorder %s1474_s15, %s1122_s8  ;;  %s1126_s27 = sshll.u32 %s1251_s20, 4  ;;  %s1127_s27 = int_to_ptr.vmem [resolvable:$false] %s1126_s27 }
 0x26e   : > { %s1128_s30 = scalar_lea.vmem %s1127_s27, 128  ;;  %p1129_p4 = scmp.lt.s32.totalorder %s1474_s15, %s1127_s27 }
 0x26f   : > { %p1124_p13 = pnand %p1123_p9, %p1391_p5  ;;  %p1130_p6 = scmp.lt.s32.totalorder %s1128_s30, %s1122_s8 }
 0x271   : > { %p1125_p2 = pneg %p1124_p13  ;;  %p1131_p12 = por %p1130_p6, %p1129_p4 }
 0x273   : > { %p1132_p0 = pnand %p1131_p12, %p1125_p2 }
 0x275   : > { %1135 = shalt.err (!%p1132_p0)
}
 0x276   : > { %s1136_s19 = scalar_lea.hbm %s1472_s17, 64  ;;  %s1140_s3 = scalar_lea.hbm %s1585_s5, 128 }
 0x277   : > { %p1137_p3 = scmp.ne.s32.totalorder %s1472_s17, %s1136_s19  ;;  %p1141_p8 = scmp.lt.s32.totalorder %s1472_s17, %s1585_s5 }
 0x278   : > { %p1142_p11 = scmp.lt.s32.totalorder %s1140_s3, %s1136_s19 }
 0x279   : > { %p1138_p10 = pnand %p1137_p3, %p1391_p5 }
 0x27a   : > { %p1143_p1 = por %p1142_p11, %p1141_p8 }
 0x27b   : > { %p1139_p7 = pneg %p1138_p10 }
 0x27d   : > { %p1144_p9 = pnand %p1143_p1, %p1139_p7 }
 0x27f   : > { %1147 = shalt.err (!%p1144_p9)
}
 0x280   : > { %889 = dma.vmem_to_hbm [thread:$0]  (%p1391_p5), %s1474_s15, 64, %s1472_s17, %s583_s11   ;;  %v574_v33 = vpop.f32.mrf.mxu0 }
 0x281   : > { %v580_v34 = vpack.c.bf16 %v574_v33, %v574_v33  ;;  %s1532_s30 = scalar_lea.hbm %s1587_s7, %s1453_s9  ;;  %s1148_s19 = scalar_lea.vmem %s636_s16, 64 }
 0x282   : > { %v873_v35 = vpop.f32.mrf.mxu0  ;;  %p1149_p13 = scmp.ne.s32.totalorder %s636_s16, %s1148_s19  ;;  %s1252_s12 = smov [#allocation13]  }
 0x283   : > { %581 = vst.msk [vmem:[%s376_s2] sm:$0xf] %vm464_vm2, %v580_v34  ;;  %s1152_s15 = sshll.u32 %s1252_s12, 4  ;;  %s1153_s15 = int_to_ptr.vmem [resolvable:$false] %s1152_s15 }
 0x284   : > { %v577_v36 = vpop.f32.mrf.mxu0  ;;  %p1150_p2 = pnand %p1149_p13, %p1391_p5  ;;  %s1154_s17 = scalar_lea.vmem %s1153_s15, 128 }
 0x285   : > { %p1155_p6 = scmp.lt.s32.totalorder %s636_s16, %s1153_s15  ;;  %p1156_p12 = scmp.lt.s32.totalorder %s1154_s17, %s1148_s19 }
 0x286   : > { %p1151_p4 = pneg %p1150_p2 }
 0x287   : > { %p1157_p0 = por %p1156_p12, %p1155_p6 }
 0x289   : > { %p1158_p3 = pnand %p1157_p0, %p1151_p4 }
 0x28b   : > { %1161 = shalt.err (!%p1158_p3)
}
 0x28c   : > { %s1162_s4 = scalar_lea.hbm %s1532_s30, 64  ;;  %s1166_s11 = scalar_lea.hbm %s1587_s7, 128 }
 0x28d   : > { %p1163_p10 = scmp.ne.s32.totalorder %s1532_s30, %s1162_s4  ;;  %p1167_p11 = scmp.lt.s32.totalorder %s1532_s30, %s1587_s7 }
 0x28e   : > { %p1168_p1 = scmp.lt.s32.totalorder %s1166_s11, %s1162_s4 }
 0x28f   : > { %p1164_p7 = pnand %p1163_p10, %p1391_p5 }
 0x290   : > { %p1169_p9 = por %p1168_p1, %p1167_p11 }
 0x291   : > { %p1165_p8 = pneg %p1164_p7 }
 0x293   : > { %p1170_p13 = pnand %p1169_p9, %p1165_p8 }
 0x295   : > { %1173 = shalt.err (!%p1170_p13)
}
 0x296   : > { %891 = dma.vmem_to_hbm [thread:$0]  (%p1391_p5), %s636_s16, 64, %s1532_s30, %s1476_s13   ;;  %v874_v37 = vpop.f32.mrf.mxu0 }
 0x297 PF: > { %s647_s22 = sand.u32 1, %s1220_s24   ;;  %p1611_p2 = scmp.ne.s32.totalorder %s1596_s10, 0 }
 0x298   : > { %p1612_p4 = scmp.ge.s32.totalorder %s1240_s29, 2  ;;  %s648_s20 = scalar_lea.sflag [#allocation4], %s647_s22 }
 0x29a   : > { %p910_p6 = pnand %p1612_p4, %p1611_p2 }
 0x29c   : > { %p911_p12 = pneg %p910_p6 }
 0x29e   : > { %1211 = dma.done.wait (%p911_p12), %s648_s20, 64  }
 0x29f   : > { %1213 = vsyncadd (%p911_p12), %s648_s20, 4294967232  ;;  %s1613_s8 = sadd.s32 4294967294, %s1240_s29  }
 0x2a0   : > { %s656_s27 = sand.u32 1, %s1613_s8  }
 0x2a1   : > { %s657_s14 = scalar_lea.sflag [#allocation12], %s656_s27 }
 0x2a2   : > { %1215 = dma.done.wait (%p911_p12), %s657_s14, 128  }
 0x2a3   : > { %1217 = vsyncadd (%p911_p12), %s657_s14, 4294967168  ;;  %s29_s29 = sadd.s32 1, %s1240_s29   ;;  %s1614_s24 = smov %s1224_s25 }
 0x2a4   : > { %p26_p5 = scmp.ge.s32.totalorder %s29_s29, 4   ;;  %s1615_s25 = smov %s1228_s26 }
 0x2a5   : > { %s1616_s26 = smov %s1403_s21  ;;  %s1617_s27 = smov %s1236_s28 }
 0x2a6   : > { %s1618_s28 = smov %s1620_s23  ;;  %28 = sbr.rel (!%p26_p5) target bundleno = 14 (0xe), region = 129 }
 0x2ab   :  { %671 = vsyncpa [#allocation3], 1 }
 0x2ac   :  { %673 = vsyncpa [#allocation3 + $0x1], 1 }
 0x2ad   :  { %674 = vsyncpa [#allocation6], 1 }
 0x2ae   :  { %675 = vsyncpa [#allocation9], 1 }
 0x2af   :  { %676 = vsyncpa [#allocation4], 1 }
 0x2b0   :  { %678 = vsyncpa [#allocation4 + $0x1], 1 }
 0x2b1   :  { %679 = vsyncpa [#allocation12], 1 }
 0x2b2   :  { %681 = vsyncpa [#allocation12 + $0x1], 1 }

// kernel: tpu_custom_call.1
= control target key start
LH: loop header
LB: loop body
LE: loop exit
PB: predicated region body
PF: predicated region fallthrough
CT: control target
= control target key end

     0   :  { %s1580_s0 = inlined_call_operand.hbm [shape: f32[2,8,32], index: 0, kind: input, shape index: {}]   ;;  %s1581_s1 = inlined_call_operand.vmem [shape: f32[1,32], index: 1, kind: input, shape index: {}]   ;;  %s1582_s2 = inlined_call_operand.hbm [shape: bf16[32,32], index: 2, kind: input, shape index: {}]   ;;  %s1583_s3 = inlined_call_operand.hbm [shape: bf16[32,32], index: 3, kind: input, shape index: {}]   ;;  %s1584_s4 = inlined_call_operand.hbm [shape: bf16[32,32], index: 4, kind: input, shape index: {}]   ;;  %s1585_s5 = inlined_call_operand.hbm [shape: bf16[2,8,32], index: 5, kind: output, shape index: {0}]   ;;  %s1586_s6 = inlined_call_operand.hbm [shape: bf16[2,8,32], index: 6, kind: output, shape index: {1}]   ;;  %s1587_s7 = inlined_call_operand.hbm [shape: bf16[2,8,32], index: 7, kind: output, shape index: {2}]  }
   0x1   :  { %1592 = sst [smem:[#allocation19_spill]] %s1582_s2 }
   0x2   :  { %1593 = sst [smem:[#allocation20_spill]] %s1583_s3 }
   0x3   :  { %1594 = sst [smem:[#allocation21_spill]] %s1584_s4 }
   0x4   :  { %13 = vsyncpa [#allocation3], 0 }
   0x5   :  { %15 = vsyncpa [#allocation3 + $0x1], 0 }
   0x6   :  { %16 = vsyncpa [#allocation6], 0 }
   0x7   :  { %17 = vsyncpa [#allocation9], 0 }
   0x8   :  { %18 = vsyncpa [#allocation4], 0 }
   0x9   :  { %20 = vsyncpa [#allocation4 + $0x1], 0 }
   0xa   :  { %21 = vsyncpa [#allocation12], 0 }
   0xb   :  { %23 = vsyncpa [#allocation12 + $0x1], 0  ;;  %s1293_s24 = smov 0   ;;  %s1295_s25 = smov 0  }
   0xc   :  { %s1297_s26 = smov 0   ;;  %s1299_s27 = smov 0  }
   0xd   :  { %s1301_s28 = smov 0   ;;  %s1303_s29 = smov 0  }
   0xe LB: > { %s1324_s30 = sadd.s32 4294967295, %s1240_s29   ;;  %s1590_s8 = sadd.s32 4294967294, %s1240_s29   ;;  %s1240_s29 = sphi %s1303_s29, %s29_s29   ;;  %s1236_s28 = sphi %s1301_s28, %s1618_s28   ;;  %s1232_s27 = sphi %s1299_s27, %s1617_s27   ;;  %s1228_s26 = sphi %s1297_s26, %s1616_s26   ;;  %s1224_s25 = sphi %s1295_s25, %s1615_s25   ;;  %s1220_s24 = sphi %s1293_s24, %s1614_s24  }
   0xf   : > { %p63_p0 = scmp.ne.s32.totalorder %s1224_s25, %s1220_s24  ;;  %p1588_p1 = scmp.eq.s32.totalorder %s1324_s30, 0 }
  0x10   : > { %p179_p3 = scmp.eq.s32.totalorder %s1590_s8, 1  ;;  %p809_p5 = scmp.ge.s32.totalorder %s1240_s29, 1 }
  0x11   : > { %p1335_p4 = por %p1588_p1, %p63_p0  ;;  %p242_p7 = scmp.lt.s32.totalorder %s1240_s29, 3 }
  0x12   : > { %p1340_p6 = por %p179_p3, %p63_p0  ;;  %s1242_s12 = smov [#allocation5]  }
  0x13   : > { %s1595_s9 = scalar_select %p1335_p4, 1, 0 }
  0x14   : > { %s1596_s10 = scalar_select %p1340_p6, 1, 0 }
  0x15   : > { %p1345_p8 = pnand %p809_p5, %p242_p7  ;;  %s257_s13 = sshll.u32 %s1242_s12, 4  ;;  %s258_s13 = int_to_ptr.vmem [resolvable:$true] %s257_s13 }
  0x16   : > { %s1243_s15 = smov [#allocation7]   ;;  %s1244_s17 = smov [#allocation8]  }
  0x17   : > { %p895_p9 = pneg %p1345_p8  ;;  %s270_s16 = sshll.u32 %s1243_s15, 4  ;;  %s271_s16 = int_to_ptr.vmem [resolvable:$true] %s270_s16 }
  0x18   : > { %s283_s18 = sshll.u32 %s1244_s17, 4  ;;  %s1001_s19 = scalar_lea.vmem %s258_s13, 256  ;;  %s284_s18 = int_to_ptr.vmem [resolvable:$true] %s283_s18 }
  0x19   : > { %p1354_p11 = pnand %p895_p9, %p1588_p1  ;;  %p1002_p13 = scmp.ne.s32.totalorder %s258_s13, %s1001_s19 }
  0x1a   : > { %p1009_p5 = scmp.lt.s32.totalorder %s258_s13, %s258_s13  ;;  %p1010_p7 = scmp.lt.s32.totalorder %s1001_s19, %s1001_s19 }
  0x1b   : > { %p992_p12 = pneg %p1354_p11 }
  0x1c   : > { %p1011_p9 = por %p1010_p7, %p1009_p5 }
  0x1d   : > { %p1004_p0 = pnand %p1002_p13, %p992_p12 }
  0x1f   : > { %p1005_p3 = pneg %p1004_p0 }
  0x21   : > { %p1012_p10 = pnand %p1011_p9, %p1005_p3 }
  0x23   : > { %1015 = shalt.err (!%p1012_p10)
}
  0x24   : > { %s1245_s20 = smov 64   ;;  %s1246_s21 = smov 4  }
  0x25   : > { %s1599_s2 = sld [smem:[#allocation19_spill]]  ;;  %s1027_s12 = scalar_lea.vmem %s271_s16, 256 }
  0x26   : > { %p1028_p1 = scmp.ne.s32.totalorder %s271_s16, %s1027_s12  ;;  %p1035_p2 = scmp.lt.s32.totalorder %s271_s16, %s271_s16 }
  0x27   : > { %p1036_p6 = scmp.lt.s32.totalorder %s1027_s12, %s1027_s12 }
  0x28   : > { %p1030_p13 = pnand %p1028_p1, %p992_p12 }
  0x29   : > { %p1037_p5 = por %p1036_p6, %p1035_p2 }
  0x2a   : > { %p1031_p0 = pneg %p1030_p13 }
  0x2b   : > { %898 = dma.hbm_to_vmem [thread:$0]  (!%p1354_p11), %s1599_s2, 256, %s258_s13, [#allocation6], %s1245_s20, %s1245_s20, %s1246_s21  }
  0x2c   : > { %p1038_p3 = pnand %p1037_p5, %p1031_p0 }
  0x2e   : > { %1041 = shalt.err (!%p1038_p3)
}
  0x2f   : > { %s1600_s3 = sld [smem:[#allocation20_spill]]  ;;  %s1053_s13 = scalar_lea.vmem %s284_s18, 256 }
  0x30   : > { %p1054_p10 = scmp.ne.s32.totalorder %s284_s18, %s1053_s13  ;;  %p1061_p9 = scmp.lt.s32.totalorder %s284_s18, %s284_s18 }
  0x31   : > { %p1062_p13 = scmp.lt.s32.totalorder %s1053_s13, %s1053_s13 }
  0x32   : > { %p1056_p7 = pnand %p1054_p10, %p992_p12 }
  0x33   : > { %p1063_p4 = por %p1062_p13, %p1061_p9 }
  0x34   : > { %p1057_p1 = pneg %p1056_p7 }
  0x35   : > { %901 = dma.hbm_to_vmem [thread:$0]  (!%p1354_p11), %s1600_s3, 256, %s271_s16, [#allocation6], %s1245_s20, %s1245_s20, %s1246_s21  }
  0x36   : > { %p1064_p2 = pnand %p1063_p4, %p1057_p1 }
  0x38   : > { %1067 = shalt.err (!%p1064_p2)
}
  0x39   : > { %s1601_s4 = sld [smem:[#allocation21_spill]]  ;;  %s50_s16 = sadd.s32 1, %s1228_s26 }
  0x3a   : > { %s41_s23 = sadd.s32 1, %s1236_s28  ;;  %p57_p4 = scmp.ne.s32.totalorder %s1228_s26, %s1224_s25 }
  0x3b   : > { %p43_p6 = scmp.ge.s32.totalorder %s41_s23, 2  ;;  %p58_p12 = scmp.eq.s32.totalorder %s1240_s29, 0 }
  0x3c   : > { %p1602_p0 = scmp.eq.s32.totalorder %s1324_s30, 1  ;;  %p922_p3 = scmp.lt.s32.totalorder %s1240_s29, 2 }
  0x3d   : > { %s1620_s23 = smov (%p43_p6, %s41_s23), 0  ;;  %p59_p10 = por %p58_p12, %p57_p4 }
  0x3e   : > { %p1391_p5 = por %p1602_p0, %p57_p4  ;;  %s297_s12 = sand.u32 1, %s1228_s26  }
  0x3f   : > { %904 = dma.hbm_to_vmem [thread:$0]  (!%p1354_p11), %s1601_s4, 256, %s284_s18, [#allocation9], %s1245_s20, %s1245_s20, %s1246_s21  }
  0x40   : > { %s45_s15 = ssub.s32 %s1236_s28, %s1620_s23  ;;  %s814_s18 = sshll.u32 %s297_s12, 3 }
  0x41   : > { %p48_p7 = scmp.eq.s32.totalorder %s45_s15, 0  ;;  %s815_s20 = sshll.u32 %s1236_s28, 7 }
  0x42   : > { %s307_s19 = scalar_lea.hbm %s1580_s0, %s815_s20  ;;  %s301_s22 = scalar_lea.vmem [#allocation2], %s814_s18 }
  0x43   : > { %s1403_s21 = scalar_select %p48_p7, %s1228_s26, %s50_s16  }
  0x44   : > { %s309_s8 = sshll.u32 %s301_s22, 4  ;;  %p1410_p11 = pnand %p922_p3, %p59_p10  ;;  %s310_s8 = int_to_ptr.vmem [resolvable:$true] %s309_s8 }
  0x45   : > { %s298_s3 = scalar_lea.sflag [#allocation3], %s297_s12  ;;  %s1081_s15 = scalar_lea.vmem %s310_s8, 128 }
  0x46   : > { %p1070_p1 = pneg %p1410_p11  ;;  %p1082_p9 = scmp.ne.s32.totalorder %s310_s8, %s1081_s15 }
  0x47   : > { %s1247_s16 = smov [#allocation2]  }
  0x48   : > { %p1084_p13 = pnand %p1082_p9, %p1070_p1  ;;  %s1086_s4 = sshll.u32 %s1247_s16, 4  ;;  %s1087_s4 = int_to_ptr.vmem [resolvable:$false] %s1086_s4 }
  0x49   : > { %s1088_s20 = scalar_lea.vmem %s1087_s4, 256  ;;  %p1089_p4 = scmp.lt.s32.totalorder %s310_s8, %s1087_s4 }
  0x4a   : > { %p1085_p2 = pneg %p1084_p13  ;;  %p1090_p6 = scmp.lt.s32.totalorder %s1088_s20, %s1081_s15 }
  0x4c   : > { %p1091_p12 = por %p1090_p6, %p1089_p4 }
  0x4e   : > { %p1092_p0 = pnand %p1091_p12, %p1085_p2 }
  0x50   : > { %1095 = shalt.err (!%p1092_p0)
}
  0x51   : > { %908 = dma.hbm_to_vmem [thread:$0]  (!%p1410_p11), %s307_s19, 128, %s310_s8, %s298_s3  }
  0x52   : > { %318 = sbr.rel (%p1345_p8) target bundleno = 663 (0x297), region = 40  ;;  %s1421_s12 = sand.u32 (!%p1345_p8), 1, %s1224_s25  }
  0x53   : > { %s817_s18 = sshll.u32 (!%p1345_p8), %s1421_s12, 3  ;;  %s321_s17 = scalar_lea.sflag (!%p1345_p8), [#allocation3], %s1421_s12 }
  0x54   : > { %s324_s13 = scalar_lea.vmem (!%p1345_p8), [#allocation2], %s817_s18  ;;  %p1605_p3 = scmp.ne.s32.totalorder (!%p1345_p8), %s1595_s9, 0 }
  0x57   : > { %1199 = dma.done.wait (%p1605_p3), %s321_s17, 128  }
  0x58   : > { %1201 = vsyncadd (%p1605_p3), %s321_s17, 4294967168  ;;  %p1606_p10 = scmp.eq.s32.totalorder %s1324_s30, 0 }
  0x5a   : > { %1203 = dma.done.wait (%p1606_p10), [#allocation6], 512   ;;  %p1607_p7 = pmov %p1606_p10 }
  0x5c   : > { %1205 = vsyncadd (%p1607_p7), [#allocation6], 4294966784  ;;  %p1608_p8 = pmov %p1607_p7 }
  0x5d   : > { %p1609_p11 = pmov %p1607_p7 }
  0x5e   : > { %1207 = dma.done.wait (%p1608_p8), [#allocation9], 256  }
  0x5f   : > { %1209 = vsyncadd (%p1609_p11), [#allocation9], 4294967040  ;;  %vm380_vm0 = vcmask 261120   ;;  %v378_v0 = vld [vmem:[%s324_s13] sm:$0xff]  ;;  %v982_v7 = vld [vmem:[#allocation5 + $0x8] sm:$0xff]   ;;  %v1248_v9 = vmov 0.0  }
  0x60   : > { %v381_v1 = vsel %vm380_vm0, %v378_v0, 0.0  ;;  %v983_v8 = vld [vmem:[#allocation7 + $0x8] sm:$0xff]   ;;  %851 = vmatprep.subr.bf16.mxu0 %v1248_v9  ;;  %859 = vmatprep.subr.bf16.mxu1 %v1248_v9  ;;  %v984_v10 = vld [vmem:[#allocation5] sm:$0xff]   ;;  %v985_v11 = vld [vmem:[#allocation7] sm:$0xff]   ;;  %vm1249_vm1 = vmmov 0   ;;  %s1449_s4 = sshll.u32 %s1421_s12, 2 }
  0x61   : > { %382 = vadd.xlane.f32.xlu0 %v381_v1  ;;  %852 = vmatpush3.bf16.msra.mxu0 %v982_v7  ;;  %v824_v16 = vld [vmem:[%s1581_s1] ss:$0 sm:$0xff]  ;;  %v986_v19 = vld [vmem:[#allocation8 + $0x8] sm:$0xff]   ;;  %v987_v21 = vld [vmem:[#allocation8] sm:$0xff]   ;;  %s587_s8 = sand.u32 1, %s1324_s30   ;;  %s1453_s9 = sshll.u32 %s1232_s27, 6 }
  0x62   : > { %860 = vmatpush3.bf16.msra.mxu1 %v983_v8  ;;  %853 = vmatprep.subr.bf16.mxu0 %v1248_v9  ;;  %s369_s11 = scalar_lea.vmem [#allocation11], %s1449_s4  ;;  %vm464_vm2 = vcmask 257024   ;;  %s1591_s22 = scalar_lea.vmem [#allocation10], %s1449_s4 }
  0x63   : > { %861 = vmatprep.subr.bf16.mxu1 %v1248_v9  ;;  %855 = vmatprep.mubr.msk.bf16.mxu0 %vm1249_vm1, %v1248_v9  ;;  %s621_s19 = sshll.u32 %s369_s11, 4  ;;  %s607_s15 = sshll.u32 %s1591_s22, 4  ;;  %s1465_s19 = int_to_ptr.vmem [resolvable:$true] %s621_s19  ;;  %s1474_s15 = int_to_ptr.vmem [resolvable:$true] %s607_s15 }
  0x64   : > { %863 = vmatprep.mubr.msk.bf16.mxu1 %vm1249_vm1, %v1248_v9  ;;  %s1463_s18 = scalar_lea.hbm %s1586_s6, %s1453_s9  ;;  %s1472_s17 = scalar_lea.hbm %s1585_s5, %s1453_s9 }
  0x65   : > { %854 = vmatpush3.bf16.msra.mxu0 %v984_v10  ;;  %s1476_s13 = scalar_lea.sflag [#allocation12], %s587_s8  ;;  %s1096_s2 = scalar_lea.vmem %s1465_s19, 64 }
  0x66   : > { %862 = vmatpush3.bf16.msra.mxu1 %v985_v11  ;;  %867 = vmatprep.subr.bf16.mxu0 %v1248_v9  ;;  %p1097_p1 = scmp.ne.s32.totalorder %s1465_s19, %s1096_s2  ;;  %s1250_s3 = smov [#allocation11]  }
  0x67   : > { %s1100_s16 = sshll.u32 %s1250_s3, 4  ;;  %s1101_s16 = int_to_ptr.vmem [resolvable:$false] %s1100_s16 }
  0x68   : > { %p1098_p9 = pnand %p1097_p1, %p1391_p5  ;;  %p1103_p2 = scmp.lt.s32.totalorder %s1465_s19, %s1101_s16 }
  0x6a   : > { %p1099_p13 = pneg %p1098_p9 }
  0xea   : > { %v383_v2 = vpop.xlane.xlu0 %382 }
  0xeb   : > { %v385_v3 = vmul.f32 0.03125, %v383_v2 }
  0xed   : > { %v386_v4 = vsub.f32 %v378_v0, %v385_v3 }
  0xef   : > { %v387_v5 = vmul.f32 %v386_v4, %v386_v4 }
  0xf1   : > { %v388_v6 = vsel %vm380_vm0, %v387_v5, 0.0 }
  0xf2   : > { %389 = vadd.xlane.f32.xlu0 %v388_v6 }
 0x17b   : > { %v390_v12 = vpop.xlane.xlu0 %389 }
 0x17c   : > { %v391_v13 = vmul.f32 0.03125, %v390_v12 }
 0x17e   : > { %v392_v14 = vadd.f32 1e-05, %v391_v13 }
 0x180   : > { %988 = vrsqrt.f32 %v392_v14 }
 0x18d   : > { %v989_v15 = vpop.eup %988 }
 0x18e   : > { %v394_v17 = vmul.f32 %v989_v15, %v386_v4 }
 0x190   : > { %v401_v18 = vmul.f32 %v824_v16, %v394_v17 }
 0x192   : > { %v402_v20 = vpack.c.bf16 %v401_v18, %v401_v18 }
 0x194   : > { %856 = vmatmul.mubr.msk.bf16.vlgmr.msra.gmra.mxu0 %vm380_vm0, %v402_v20  ;;  %864 = vmatmul.mubr.msk.bf16.vlgmr.msra.gmra.mxu1 %vm380_vm0, %v402_v20 }
 0x195   : > { %868 = vmatpush3.bf16.msra.mxu0 %v986_v19  ;;  %871 = vmatprep.mubr.msk.bf16.mxu0 %vm1249_vm1, %v1248_v9 }
 0x196   : > { %869 = vmatprep.subr.bf16.mxu0 %v1248_v9 }
 0x199   : > { %870 = vmatpush3.bf16.msra.mxu0 %v987_v21 }
 0x19c   : > { %872 = vmatmul.mubr.msk.bf16.vlgmr.msra.gmra.mxu0 %vm380_vm0, %v402_v20 }
 0x254   : > { %v456_v22 = vpop.f32.mrf.mxu0  ;;  %v516_v23 = vpop.f32.mrf.mxu1 }
 0x255   : > { %v462_v24 = vmul.f32 0.35355338, %v456_v22  ;;  %v522_v25 = vpack.c.bf16 %v516_v23, %v516_v23 }
 0x256   : > { %v857_v26 = vpop.f32.mrf.mxu0  ;;  %v865_v27 = vpop.f32.mrf.mxu1 }
 0x257   : > { %v463_v28 = vpack.c.bf16 %v462_v24, %v462_v24  ;;  %523 = vst.msk [vmem:[%s369_s11] sm:$0xf] %vm464_vm2, %v522_v25  ;;  %s1102_s11 = scalar_lea.vmem %s1101_s16, 128 }
 0x258   : > { %v459_v29 = vpop.f32.mrf.mxu0  ;;  %v519_v30 = vpop.f32.mrf.mxu1  ;;  %p1104_p4 = scmp.lt.s32.totalorder %s1102_s11, %s1096_s2 }
 0x25a   : > { %p1105_p6 = por %p1104_p4, %p1103_p2 }
 0x25c   : > { %p1106_p12 = pnand %p1105_p6, %p1099_p13 }
 0x25e   : > { %1109 = shalt.err (!%p1106_p12)
}
 0x25f   : > { %s1110_s8 = scalar_lea.hbm %s1463_s18, 64  ;;  %s1114_s30 = scalar_lea.hbm %s1586_s6, 128 }
 0x260   : > { %p1111_p0 = scmp.ne.s32.totalorder %s1463_s18, %s1110_s8  ;;  %p1115_p7 = scmp.lt.s32.totalorder %s1463_s18, %s1586_s6 }
 0x261   : > { %p1116_p8 = scmp.lt.s32.totalorder %s1114_s30, %s1110_s8 }
 0x262   : > { %p1112_p3 = pnand %p1111_p0, %p1391_p5 }
 0x263   : > { %p1117_p11 = por %p1116_p8, %p1115_p7 }
 0x264   : > { %p1113_p10 = pneg %p1112_p3 }
 0x266   : > { %p1118_p1 = pnand %p1117_p11, %p1113_p10 }
 0x268   : > { %1121 = shalt.err (!%p1118_p1)
}
 0x269   : > { %890 = dma.vmem_to_hbm [thread:$0]  (%p1391_p5), %s1465_s19, 64, %s1463_s18, %s1476_s13   ;;  %v858_v31 = vpop.f32.mrf.mxu0  ;;  %v866_v32 = vpop.f32.mrf.mxu1 }
 0x26a   : > { %s1610_s22 = scalar_lea.vmem [#allocation10], %s1449_s4  ;;  %s376_s2 = scalar_lea.vmem [#allocation13], %s1449_s4 }
 0x26b   : > { %465 = vst.msk [vmem:[%s1610_s22] sm:$0xf] %vm464_vm2, %v463_v28  ;;  %s1505_s16 = sshll.u32 %s376_s2, 4  ;;  %s583_s11 = scalar_lea.sflag [#allocation4], %s1421_s12  ;;  %s636_s16 = int_to_ptr.vmem [resolvable:$true] %s1505_s16 }
 0x26c   : > { %s1122_s8 = scalar_lea.vmem %s1474_s15, 64  ;;  %s1251_s20 = smov [#allocation10]  }
 0x26d   : > { %p1123_p9 = scmp.ne.s32.totalorder %s1474_s15, %s1122_s8  ;;  %s1126_s27 = sshll.u32 %s1251_s20, 4  ;;  %s1127_s27 = int_to_ptr.vmem [resolvable:$false] %s1126_s27 }
 0x26e   : > { %s1128_s30 = scalar_lea.vmem %s1127_s27, 128  ;;  %p1129_p4 = scmp.lt.s32.totalorder %s1474_s15, %s1127_s27 }
 0x26f   : > { %p1124_p13 = pnand %p1123_p9, %p1391_p5  ;;  %p1130_p6 = scmp.lt.s32.totalorder %s1128_s30, %s1122_s8 }
 0x271   : > { %p1125_p2 = pneg %p1124_p13  ;;  %p1131_p12 = por %p1130_p6, %p1129_p4 }
 0x273   : > { %p1132_p0 = pnand %p1131_p12, %p1125_p2 }
 0x275   : > { %1135 = shalt.err (!%p1132_p0)
}
 0x276   : > { %s1136_s19 = scalar_lea.hbm %s1472_s17, 64  ;;  %s1140_s3 = scalar_lea.hbm %s1585_s5, 128 }
 0x277   : > { %p1137_p3 = scmp.ne.s32.totalorder %s1472_s17, %s1136_s19  ;;  %p1141_p8 = scmp.lt.s32.totalorder %s1472_s17, %s1585_s5 }
 0x278   : > { %p1142_p11 = scmp.lt.s32.totalorder %s1140_s3, %s1136_s19 }
 0x279   : > { %p1138_p10 = pnand %p1137_p3, %p1391_p5 }
 0x27a   : > { %p1143_p1 = por %p1142_p11, %p1141_p8 }
 0x27b   : > { %p1139_p7 = pneg %p1138_p10 }
 0x27d   : > { %p1144_p9 = pnand %p1143_p1, %p1139_p7 }
 0x27f   : > { %1147 = shalt.err (!%p1144_p9)
}
 0x280   : > { %889 = dma.vmem_to_hbm [thread:$0]  (%p1391_p5), %s1474_s15, 64, %s1472_s17, %s583_s11   ;;  %v574_v33 = vpop.f32.mrf.mxu0 }
 0x281   : > { %v580_v34 = vpack.c.bf16 %v574_v33, %v574_v33  ;;  %s1532_s30 = scalar_lea.hbm %s1587_s7, %s1453_s9  ;;  %s1148_s19 = scalar_lea.vmem %s636_s16, 64 }
 0x282   : > { %v873_v35 = vpop.f32.mrf.mxu0  ;;  %p1149_p13 = scmp.ne.s32.totalorder %s636_s16, %s1148_s19  ;;  %s1252_s12 = smov [#allocation13]  }
 0x283   : > { %581 = vst.msk [vmem:[%s376_s2] sm:$0xf] %vm464_vm2, %v580_v34  ;;  %s1152_s15 = sshll.u32 %s1252_s12, 4  ;;  %s1153_s15 = int_to_ptr.vmem [resolvable:$false] %s1152_s15 }
 0x284   : > { %v577_v36 = vpop.f32.mrf.mxu0  ;;  %p1150_p2 = pnand %p1149_p13, %p1391_p5  ;;  %s1154_s17 = scalar_lea.vmem %s1153_s15, 128 }
 0x285   : > { %p1155_p6 = scmp.lt.s32.totalorder %s636_s16, %s1153_s15  ;;  %p1156_p12 = scmp.lt.s32.totalorder %s1154_s17, %s1148_s19 }
 0x286   : > { %p1151_p4 = pneg %p1150_p2 }
 0x287   : > { %p1157_p0 = por %p1156_p12, %p1155_p6 }
 0x289   : > { %p1158_p3 = pnand %p1157_p0, %p1151_p4 }
 0x28b   : > { %1161 = shalt.err (!%p1158_p3)
}
 0x28c   : > { %s1162_s4 = scalar_lea.hbm %s1532_s30, 64  ;;  %s1166_s11 = scalar_lea.hbm %s1587_s7, 128 }
 0x28d   : > { %p1163_p10 = scmp.ne.s32.totalorder %s1532_s30, %s1162_s4  ;;  %p1167_p11 = scmp.lt.s32.totalorder %s1532_s30, %s1587_s7 }
 0x28e   : > { %p1168_p1 = scmp.lt.s32.totalorder %s1166_s11, %s1162_s4 }
 0x28f   : > { %p1164_p7 = pnand %p1163_p10, %p1391_p5 }
 0x290   : > { %p1169_p9 = por %p1168_p1, %p1167_p11 }
 0x291   : > { %p1165_p8 = pneg %p1164_p7 }
 0x293   : > { %p1170_p13 = pnand %p1169_p9, %p1165_p8 }
 0x295   : > { %1173 = shalt.err (!%p1170_p13)
}
 0x296   : > { %891 = dma.vmem_to_hbm [thread:$0]  (%p1391_p5), %s636_s16, 64, %s1532_s30, %s1476_s13   ;;  %v874_v37 = vpop.f32.mrf.mxu0 }
 0x297 PF: > { %s647_s22 = sand.u32 1, %s1220_s24   ;;  %p1611_p2 = scmp.ne.s32.totalorder %s1596_s10, 0 }
 0x298   : > { %p1612_p4 = scmp.ge.s32.totalorder %s1240_s29, 2  ;;  %s648_s20 = scalar_lea.sflag [#allocation4], %s647_s22 }
 0x29a   : > { %p910_p6 = pnand %p1612_p4, %p1611_p2 }
 0x29c   : > { %p911_p12 = pneg %p910_p6 }
 0x29e   : > { %1211 = dma.done.wait (%p911_p12), %s648_s20, 64  }
 0x29f   : > { %1213 = vsyncadd (%p911_p12), %s648_s20, 4294967232  ;;  %s1613_s8 = sadd.s32 4294967294, %s1240_s29  }
 0x2a0   : > { %s656_s27 = sand.u32 1, %s1613_s8  }
 0x2a1   : > { %s657_s14 = scalar_lea.sflag [#allocation12], %s656_s27 }
 0x2a2   : > { %1215 = dma.done.wait (%p911_p12), %s657_s14, 128  }
 0x2a3   : > { %1217 = vsyncadd (%p911_p12), %s657_s14, 4294967168  ;;  %s29_s29 = sadd.s32 1, %s1240_s29   ;;  %s1614_s24 = smov %s1224_s25 }
 0x2a4   : > { %p26_p5 = scmp.ge.s32.totalorder %s29_s29, 4   ;;  %s1615_s25 = smov %s1228_s26 }
 0x2a5   : > { %s1616_s26 = smov %s1403_s21  ;;  %s1617_s27 = smov %s1236_s28 }
 0x2a6   : > { %s1618_s28 = smov %s1620_s23  ;;  %28 = sbr.rel (!%p26_p5) target bundleno = 14 (0xe), region = 129 }
 0x2ab   :  { %671 = vsyncpa [#allocation3], 1 }
 0x2ac   :  { %673 = vsyncpa [#allocation3 + $0x1], 1 }
 0x2ad   :  { %674 = vsyncpa [#allocation6], 1 }
 0x2ae   :  { %675 = vsyncpa [#allocation9], 1 }
 0x2af   :  { %676 = vsyncpa [#allocation4], 1 }
 0x2b0   :  { %678 = vsyncpa [#allocation4 + $0x1], 1 }
 0x2b1   :  { %679 = vsyncpa [#allocation12], 1 }
 0x2b2   :  { %681 = vsyncpa [#allocation12 + $0x1], 1 }

</bundles_post_ra>
